<compile_context>
chip_gen: v7x
topology: tpu7x:2x2x1
jax: 0.10.0
libtpu: 0.0.40
codegen_flags: <defaults>
</compile_context>

<pallas_src>
import jax
import jax.numpy as jnp
from jax.experimental import pallas as pl
from jax.experimental.pallas import tpu as pltpu


def _fsp_kernel(x_ref, spool_ref, s1t_ref, s2t_ref, wband_ref, w3_ref, bias_ref,
                o_ref, pooled_ref):
    H = s1t_ref.shape[0]
    W = s2t_ref.shape[0]
    GC = w3_ref.shape[1]                 # rows (= images_per_group * C) per inner step
    n_inner = x_ref.shape[0] // GC

    # (1) Pooling for the whole block (both branches, all three conv taps) as a
    #     single lane-dense MXU matmul against a constant 0/1 selector.
    pooled_ref[...] = jnp.dot(x_ref[...], spool_ref[...],
                              preferred_element_type=jnp.float32)

    # Hoist loop-invariant constants out of the inner loop (JAX does not CSE).
    s1t = s1t_ref[...]                   # (H, HW)
    s2t = s2t_ref[...]                   # (W, HW)
    w1t = [wband_ref[k] for k in range(3)]          # each (GCo, GC)
    w2t = [wband_ref[3 + k] for k in range(3)]
    w3m = w3_ref[...]                    # (GCo, GC)
    b1 = bias_ref[0]                     # (GCo, 1)
    b2 = bias_ref[1]
    b3 = bias_ref[2]

    def body(g, carry):
        r0 = g * GC
        if not isinstance(r0, int):
            r0 = pl.multiple_of(r0, GC)
        p = pooled_ref[pl.ds(r0, GC), :]                       # (GC, 3H+3W)

        # band conv (3,1)+BN1 / (1,3)+BN2 over the pooled strips (shifts were
        # folded into the pooling selector; weights are block-diagonal per group)
        y1 = b1 + (jnp.dot(w1t[0], p[:, 0:H], preferred_element_type=jnp.float32)
                   + jnp.dot(w1t[1], p[:, H:2 * H], preferred_element_type=jnp.float32)
                   + jnp.dot(w1t[2], p[:, 2 * H:3 * H], preferred_element_type=jnp.float32))
        c0 = 3 * H
        y2 = b2 + (jnp.dot(w2t[0], p[:, c0:c0 + W], preferred_element_type=jnp.float32)
                   + jnp.dot(w2t[1], p[:, c0 + W:c0 + 2 * W], preferred_element_type=jnp.float32)
                   + jnp.dot(w2t[2], p[:, c0 + 2 * W:c0 + 3 * W], preferred_element_type=jnp.float32))

        # broadcast back onto the lane-dense H*W axis; relu(x1*x2); 1x1 conv;
        # sigmoid gate; multiply with the identity input.
        y1f = jnp.dot(y1, s1t, preferred_element_type=jnp.float32)   # (GC, HW)
        y2f = jnp.dot(y2, s2t, preferred_element_type=jnp.float32)   # (GC, HW)
        a = jnp.maximum(y1f * y2f, 0.0)

        z = jnp.dot(w3m, a, preferred_element_type=jnp.float32) + b3
        xg = x_ref[pl.ds(r0, GC), :]
        o_ref[pl.ds(r0, GC), :] = (jax.nn.sigmoid(z)
                                   * xg.astype(jnp.float32)).astype(o_ref.dtype)
        return carry

    if n_inner <= 4:                      # small blocks: cheap static unroll
        for g in range(n_inner):
            body(g, 0)
    else:                                 # big blocks: bound code size / live ranges
        jax.lax.fori_loop(0, n_inner, body, 0)


def _vmem_capacity_bytes():
    try:
        cap = getattr(pltpu.get_tpu_info(), "vmem_capacity_bytes", None)
        if cap:
            return int(cap)
    except Exception:
        pass
    return 64 * 1024 * 1024               # conservative fallback (v7x per-core VMEM)


def fsp_block_pallas(x_nchw, params, eps=1e-5, block_batch=None):
    (w1, g1, be1, rm1, rv1,
     w2, g2, be2, rm2, rv2,
     w3, b3) = params
    N, C, H, W = x_nchw.shape
    Co = w1.shape[0]
    # conv3 input channels and the final gating multiply require Co == C.
    assert Co == C, "FSPBlock forward requires inplanes == outplanes"
    HW = H * W
    f32 = jnp.float32
    io_dtype = x_nchw.dtype               # bf16 in -> bf16 HBM traffic & output
    itm = jnp.dtype(io_dtype).itemsize

    # ---- fold eval-mode BatchNorm + pooling 1/W, 1/H into the band-conv weights
    s1bn = (g1 / jnp.sqrt(rv1 + eps)).astype(f32)
    s2bn = (g2 / jnp.sqrt(rv2 + eps)).astype(f32)
    w1_eff = w1[:, :, :, 0].astype(f32) * s1bn[:, None, None] * (1.0 / W)  # (Co,C,3)
    w2_eff = w2[:, :, 0, :].astype(f32) * s2bn[:, None, None] * (1.0 / H)  # (Co,C,3)
    b1_eff = be1.astype(f32) - rm1.astype(f32) * s1bn                      # (Co,)
    b2_eff = be2.astype(f32) - rm2.astype(f32) * s2bn
    w3_eff = w3[:, :, 0, 0].astype(f32)                                    # (Co,C)
    b3_eff = b3.astype(f32)

    # ---- constant selector matrices (pool-sum with folded tap shifts; broadcast)
    hp = jnp.repeat(jnp.arange(H), W)          # row l = h'*W + w'  ->  h'
    wp = jnp.tile(jnp.arange(W), H)            #                    ->  w'
    hh = jnp.arange(H)
    ww = jnp.arange(W)

    def sel_h(shift):   # (HW, H): column h sums x[., h+shift, :] (zero if OOB)
        return (hp[:, None] == (hh[None, :] + shift)).astype(io_dtype)

    def sel_w(shift):   # (HW, W): column w sums x[., :, w+shift]
        return (wp[:, None] == (ww[None, :] + shift)).astype(io_dtype)

    s_pool = jnp.concatenate([sel_h(-1), sel_h(0), sel_h(1),
                              sel_w(-1), sel_w(0), sel_w(1)], axis=1)   # (HW, 3H+3W)
    s1t = (hh[:, None] == hp[None, :]).astype(f32)       # (H, HW)
    s2t = (ww[:, None] == wp[None, :]).astype(f32)       # (W, HW)

    # ---- images per grid step from a generation-aware VMEM budget -----------
    vmem_cap = _vmem_capacity_bytes()
    const_bytes = (HW * 3 * (H + W)) * itm + 2 * (H + W) * HW * 4 + 64 * 1024
    per_img = 4 * C * HW * itm + C * 3 * (H + W) * 4   # in+out (x2 buffered) + scratch
    budget = max(per_img, int(vmem_cap * 0.45) - 2 * const_bytes)
    bb_cap = max(1, budget // per_img)
    # Prefer a few pipelined grid steps when blocks stay comfortably large, so
    # BlockSpec double-buffering can hide the HBM traffic (esp. on 2-TC parts);
    # never shrink to tiny overhead-dominated steps just to get more steps.
    if bb_cap >= N:
        if N % 4 == 0 and (N // 4) * C * HW * itm >= (2 << 20):
            bb_cap = N // 4
        elif N % 2 == 0 and (N // 2) * C * HW * itm >= (1 << 20):
            bb_cap = N // 2
    if block_batch is None:
        cands = [d for d in range(1, N + 1)
                 if N % d == 0 and (d == N or (d * C) % 8 == 0)]
        fits = [d for d in cands if d <= bb_cap]
        block_batch = max(fits) if fits else min(cands)
    B_blk = block_batch
    assert N % B_blk == 0
    BR = B_blk * C                          # sublane rows per grid step

    # ---- inner grouping: G images per inner iteration (G*C ~ 8..32 sublanes) --
    G = 1
    if C < 32:
        for g in range(max(1, 32 // C), 0, -1):
            if B_blk % g == 0 and (g == 1 or (g * C) % 8 == 0):
                G = g
                break
    GC = G * C

    def bdg(wm):        # (Co, C) -> block-diagonal (G*Co, G*C)
        eye_g = jnp.eye(G, dtype=f32)
        return (eye_g[:, None, :, None] * wm[None, :, None, :]).reshape(G * Co, G * C)

    wband = jnp.stack([bdg(w1_eff[:, :, 0]), bdg(w1_eff[:, :, 1]), bdg(w1_eff[:, :, 2]),
                       bdg(w2_eff[:, :, 0]), bdg(w2_eff[:, :, 1]), bdg(w2_eff[:, :, 2])])
    w3g = bdg(w3_eff)                                        # (G*Co, G*C)
    biasg = jnp.stack([jnp.tile(b1_eff, G), jnp.tile(b2_eff, G),
                       jnp.tile(b3_eff, G)])[:, :, None]     # (3, G*Co, 1)

    # Free reshape: NCHW memory order kept; batch*channel on sublanes, H*W on lanes.
    x_flat = x_nchw.reshape(N * C, HW)

    grid = (N // B_blk,)
    flops = int(2 * N * C * HW * 3 * (H + W)        # pooling matmul
                + 2 * N * Co * HW * (H + W)         # broadcast-back matmuls
                + 2 * N * Co * GC * HW              # 1x1 conv (block-diag)
                + 12 * N * Co * GC * (H + W))       # band convs
    cost = pl.CostEstimate(flops=flops,
                           transcendentals=int(N * C * HW),
                           bytes_accessed=int(2 * N * C * HW * itm + const_bytes))

    out_flat = pl.pallas_call(
        _fsp_kernel,
        out_shape=jax.ShapeDtypeStruct((N * C, HW), io_dtype),
        grid=grid,
        in_specs=[
            pl.BlockSpec((BR, HW), lambda i: (i, 0)),                 # x block
            pl.BlockSpec((HW, 3 * (H + W)), lambda i: (0, 0)),        # pooling selector
            pl.BlockSpec((H, HW), lambda i: (0, 0)),                  # broadcast (H)
            pl.BlockSpec((W, HW), lambda i: (0, 0)),                  # broadcast (W)
            pl.BlockSpec((6, G * Co, GC), lambda i: (0, 0, 0)),       # band weights
            pl.BlockSpec((G * Co, GC), lambda i: (0, 0)),             # conv3 weight
            pl.BlockSpec((3, G * Co, 1), lambda i: (0, 0, 0)),        # biases
        ],
        out_specs=pl.BlockSpec((BR, HW), lambda i: (i, 0)),
        scratch_shapes=[pltpu.VMEM((BR, 3 * (H + W)), jnp.float32)],
        compiler_params=pltpu.CompilerParams(
            dimension_semantics=("parallel",),
            vmem_limit_bytes=int(vmem_cap * 0.8),
        ),
        cost_estimate=cost,
    )(x_flat, s_pool, s1t, s2t, wband, w3g, biasg)

    return out_flat.reshape(N, C, H, W)


def fsp_block_ref(x, params, eps=1e-5):
    """Plain-JAX reference mirroring the PyTorch forward (eval-mode BN), NCHW."""
    (w1, g1, be1, rm1, rv1, w2, g2, be2, rm2, rv2, w3, b3) = params
    N, C, H, W = x.shape
    Co = w1.shape[0]
    x1 = jnp.mean(x, axis=3)                      # (N,C,H)   pool1
    x2 = jnp.mean(x, axis=2)                      # (N,C,W)   pool2

    x1p = jnp.pad(x1, ((0, 0), (0, 0), (1, 1)))
    y1 = jnp.zeros((N, Co, H), jnp.float32)
    for k in range(3):
        y1 = y1 + jnp.einsum('oc,nch->noh', w1[:, :, k, 0], x1p[:, :, k:k + H])
    y1 = (y1 - rm1[None, :, None]) / jnp.sqrt(rv1 + eps)[None, :, None] \
         * g1[None, :, None] + be1[None, :, None]

    x2p = jnp.pad(x2, ((0, 0), (0, 0), (1, 1)))
    y2 = jnp.zeros((N, Co, W), jnp.float32)
    for k in range(3):
        y2 = y2 + jnp.einsum('oc,ncw->now', w2[:, :, 0, k], x2p[:, :, k:k + W])
    y2 = (y2 - rm2[None, :, None]) / jnp.sqrt(rv2 + eps)[None, :, None] \
         * g2[None, :, None] + be2[None, :, None]

    a = jax.nn.relu(y1[:, :, :, None] * y2[:, :, None, :])       # (N,Co,H,W)
    z = jnp.einsum('oc,nchw->nohw', w3[:, :, 0, 0], a) + b3[None, :, None, None]
    return jax.nn.sigmoid(z) * x


if __name__ == "__main__":
    # inplanes == outplanes is required for the module's own forward to be valid
    # (conv3 expects `inplanes` channels and the final mul needs matching C).
    N, C, H, W = 2, 4, 16, 16
    ks = jax.random.split(jax.random.PRNGKey(0), 13)

    w1 = 0.4 * jax.random.normal(ks[0], (C, C, 3, 1), jnp.float32)     # conv1 (3,1)
    g1 = 1.0 + 0.1 * jax.random.normal(ks[1], (C,), jnp.float32)
    be1 = 0.1 * jax.random.normal(ks[2], (C,), jnp.float32)
    rm1 = 0.1 * jax.random.normal(ks[3], (C,), jnp.float32)
    rv1 = 0.8 + 0.4 * jax.random.uniform(ks[4], (C,), jnp.float32)

    w2 = 0.4 * jax.random.normal(ks[5], (C, C, 1, 3), jnp.float32)     # conv2 (1,3)
    g2 = 1.0 + 0.1 * jax.random.normal(ks[6], (C,), jnp.float32)
    be2 = 0.1 * jax.random.normal(ks[7], (C,), jnp.float32)
    rm2 = 0.1 * jax.random.normal(ks[8], (C,), jnp.float32)
    rv2 = 0.8 + 0.4 * jax.random.uniform(ks[9], (C,), jnp.float32)

    w3 = 0.4 * jax.random.normal(ks[10], (C, C, 1, 1), jnp.float32)    # conv3 1x1
    b3 = 0.1 * jax.random.normal(ks[11], (C,), jnp.float32)

    x = jax.random.normal(ks[12], (N, C, H, W), jnp.float32)

    params = (w1, g1, be1, rm1, rv1, w2, g2, be2, rm2, rv2, w3, b3)

    out = jax.block_until_ready(fsp_block_pallas(x, params))
    ref = fsp_block_ref(x, params)

    assert out.shape == (N, C, H, W), out.shape
    assert bool(jnp.all(jnp.isfinite(out)))
    if not jnp.allclose(out, ref, atol=1e-2, rtol=1e-2):
        raise AssertionError("Pallas kernel does not match JAX reference: max |diff| = "
                             f"{float(jnp.max(jnp.abs(out - ref)))}")
    print("KERNEL_OK")
</pallas_src>

<mosaic_0001>
module attributes {stable_mosaic.version = 11 : i64} {
  func.func @_fsp_kernel(%arg0: i32, %arg1: memref<8x256xf32, #tpu.memory_space<vmem>>, %arg2: memref<256x96xf32, #tpu.memory_space<vmem>>, %arg3: memref<16x256xf32, #tpu.memory_space<vmem>>, %arg4: memref<16x256xf32, #tpu.memory_space<vmem>>, %arg5: memref<6x8x8xf32, #tpu.memory_space<vmem>>, %arg6: memref<8x8xf32, #tpu.memory_space<vmem>>, %arg7: memref<3x8x1xf32, #tpu.memory_space<vmem>>, %arg8: memref<8x256xf32, #tpu.memory_space<vmem>>, %arg9: memref<8x96xf32, #tpu.memory_space<vmem>>) attributes {dimension_semantics = [#tpu.dimension_semantics<parallel>], iteration_bounds = array<i64: 1>, scalar_prefetch = 0 : i64, scratch_operands = 1 : i64, tpu.core_type = #tpu.core_type<tc>, window_params = [{transform_indices = @transform_0, window_bounds = array<i64: 8, 256>}, {pipeline_mode = #tpu.pipeline_mode<synchronous>, transform_indices = @transform_1, window_bounds = array<i64: 256, 96>}, {pipeline_mode = #tpu.pipeline_mode<synchronous>, transform_indices = @transform_2, window_bounds = array<i64: 16, 256>}, {pipeline_mode = #tpu.pipeline_mode<synchronous>, transform_indices = @transform_3, window_bounds = array<i64: 16, 256>}, {pipeline_mode = #tpu.pipeline_mode<synchronous>, transform_indices = @transform_4, window_bounds = array<i64: 6, 8, 8>}, {pipeline_mode = #tpu.pipeline_mode<synchronous>, transform_indices = @transform_5, window_bounds = array<i64: 8, 8>}, {pipeline_mode = #tpu.pipeline_mode<synchronous>, transform_indices = @transform_6, window_bounds = array<i64: 3, 8, 1>}, {transform_indices = @transform_7, window_bounds = array<i64: 8, 256>}]} {
    %c0 = arith.constant 0 : index
    %c0_0 = arith.constant 0 : index
    %0 = vector.load %arg1[%c0, %c0_0] : memref<8x256xf32, #tpu.memory_space<vmem>>, vector<8x256xf32>
    %c0_1 = arith.constant 0 : index
    %c0_2 = arith.constant 0 : index
    %1 = vector.load %arg2[%c0_1, %c0_2] : memref<256x96xf32, #tpu.memory_space<vmem>>, vector<256x96xf32>
    %cst = arith.constant dense<0.000000e+00> : vector<8x96xf32>
    %2 = tpu.matmul %0, %1, %cst {dimension_numbers = #tpu.dot_dimension_numbers<[1], [0], [0], [1], [0, 0, 1, 1], [], []>} : vector<8x256xf32>, vector<256x96xf32>, vector<8x96xf32> -> vector<8x96xf32>
    %c0_3 = arith.constant 0 : index
    %c0_4 = arith.constant 0 : index
    %3 = vector.load %arg9[%c0_3, %c0_4] : memref<8x96xf32, #tpu.memory_space<vmem>>, vector<8x96xf32>
    tpu.vector_store %arg9[%c0_3, %c0_4], %2 {strides = array<i32>} : memref<8x96xf32, #tpu.memory_space<vmem>>, vector<8x96xf32>,
    %c0_5 = arith.constant 0 : index
    %c0_6 = arith.constant 0 : index
    %4 = vector.load %arg3[%c0_5, %c0_6] : memref<16x256xf32, #tpu.memory_space<vmem>>, vector<16x256xf32>
    %c0_7 = arith.constant 0 : index
    %c0_8 = arith.constant 0 : index
    %5 = vector.load %arg4[%c0_7, %c0_8] : memref<16x256xf32, #tpu.memory_space<vmem>>, vector<16x256xf32>
    %c0_9 = arith.constant 0 : index
    %c0_10 = arith.constant 0 : index
    %c0_11 = arith.constant 0 : index
    %6 = vector.load %arg5[%c0_9, %c0_10, %c0_11] : memref<6x8x8xf32, #tpu.memory_space<vmem>>, vector<1x8x8xf32>
    %7 = vector.shape_cast %6 : vector<1x8x8xf32> to vector<8x8xf32>
    %c1 = arith.constant 1 : index
    %c0_12 = arith.constant 0 : index
    %c0_13 = arith.constant 0 : index
    %8 = vector.load %arg5[%c1, %c0_12, %c0_13] : memref<6x8x8xf32, #tpu.memory_space<vmem>>, vector<1x8x8xf32>
    %9 = vector.shape_cast %8 : vector<1x8x8xf32> to vector<8x8xf32>
    %c2 = arith.constant 2 : index
    %c0_14 = arith.constant 0 : index
    %c0_15 = arith.constant 0 : index
    %10 = vector.load %arg5[%c2, %c0_14, %c0_15] : memref<6x8x8xf32, #tpu.memory_space<vmem>>, vector<1x8x8xf32>
    %11 = vector.shape_cast %10 : vector<1x8x8xf32> to vector<8x8xf32>
    %c3 = arith.constant 3 : index
    %c0_16 = arith.constant 0 : index
    %c0_17 = arith.constant 0 : index
    %12 = vector.load %arg5[%c3, %c0_16, %c0_17] : memref<6x8x8xf32, #tpu.memory_space<vmem>>, vector<1x8x8xf32>
    %13 = vector.shape_cast %12 : vector<1x8x8xf32> to vector<8x8xf32>
    %c4 = arith.constant 4 : index
    %c0_18 = arith.constant 0 : index
    %c0_19 = arith.constant 0 : index
    %14 = vector.load %arg5[%c4, %c0_18, %c0_19] : memref<6x8x8xf32, #tpu.memory_space<vmem>>, vector<1x8x8xf32>
    %15 = vector.shape_cast %14 : vector<1x8x8xf32> to vector<8x8xf32>
    %c5 = arith.constant 5 : index
    %c0_20 = arith.constant 0 : index
    %c0_21 = arith.constant 0 : index
    %16 = vector.load %arg5[%c5, %c0_20, %c0_21] : memref<6x8x8xf32, #tpu.memory_space<vmem>>, vector<1x8x8xf32>
    %17 = vector.shape_cast %16 : vector<1x8x8xf32> to vector<8x8xf32>
    %c0_22 = arith.constant 0 : index
    %c0_23 = arith.constant 0 : index
    %18 = vector.load %arg6[%c0_22, %c0_23] : memref<8x8xf32, #tpu.memory_space<vmem>>, vector<8x8xf32>
    %c0_24 = arith.constant 0 : index
    %c0_25 = arith.constant 0 : index
    %c0_26 = arith.constant 0 : index
    %19 = vector.load %arg7[%c0_24, %c0_25, %c0_26] : memref<3x8x1xf32, #tpu.memory_space<vmem>>, vector<1x8x1xf32>
    %20 = vector.shape_cast %19 : vector<1x8x1xf32> to vector<8x1xf32>
    %c1_27 = arith.constant 1 : index
    %c0_28 = arith.constant 0 : index
    %c0_29 = arith.constant 0 : index
    %21 = vector.load %arg7[%c1_27, %c0_28, %c0_29] : memref<3x8x1xf32, #tpu.memory_space<vmem>>, vector<1x8x1xf32>
    %22 = vector.shape_cast %21 : vector<1x8x1xf32> to vector<8x1xf32>
    %c2_30 = arith.constant 2 : index
    %c0_31 = arith.constant 0 : index
    %c0_32 = arith.constant 0 : index
    %23 = vector.load %arg7[%c2_30, %c0_31, %c0_32] : memref<3x8x1xf32, #tpu.memory_space<vmem>>, vector<1x8x1xf32>
    %24 = vector.shape_cast %23 : vector<1x8x1xf32> to vector<8x1xf32>
    %c0_33 = arith.constant 0 : index
    %c0_34 = arith.constant 0 : index
    %25 = vector.load %arg9[%c0_33, %c0_34] : memref<8x96xf32, #tpu.memory_space<vmem>>, vector<8x96xf32>
    %26 = vector.extract_strided_slice %25 {offsets = [0, 0], sizes = [8, 16], strides = [1, 1]} : vector<8x96xf32> to vector<8x16xf32>
    %cst_35 = arith.constant dense<0.000000e+00> : vector<8x16xf32>
    %27 = tpu.matmul %7, %26, %cst_35 {dimension_numbers = #tpu.dot_dimension_numbers<[1], [0], [0], [1], [0, 0, 1, 1], [], []>} : vector<8x8xf32>, vector<8x16xf32>, vector<8x16xf32> -> vector<8x16xf32>
    %28 = vector.extract_strided_slice %25 {offsets = [0, 16], sizes = [8, 16], strides = [1, 1]} : vector<8x96xf32> to vector<8x16xf32>
    %cst_36 = arith.constant dense<0.000000e+00> : vector<8x16xf32>
    %29 = tpu.matmul %9, %28, %cst_36 {dimension_numbers = #tpu.dot_dimension_numbers<[1], [0], [0], [1], [0, 0, 1, 1], [], []>} : vector<8x8xf32>, vector<8x16xf32>, vector<8x16xf32> -> vector<8x16xf32>
    %30 = arith.addf %27, %29 : vector<8x16xf32>
    %31 = vector.extract_strided_slice %25 {offsets = [0, 32], sizes = [8, 16], strides = [1, 1]} : vector<8x96xf32> to vector<8x16xf32>
    %cst_37 = arith.constant dense<0.000000e+00> : vector<8x16xf32>
    %32 = tpu.matmul %11, %31, %cst_37 {dimension_numbers = #tpu.dot_dimension_numbers<[1], [0], [0], [1], [0, 0, 1, 1], [], []>} : vector<8x8xf32>, vector<8x16xf32>, vector<8x16xf32> -> vector<8x16xf32>
    %33 = arith.addf %30, %32 : vector<8x16xf32>
    %34 = vector.broadcast %20 : vector<8x1xf32> to vector<8x16xf32>
    %35 = arith.addf %34, %33 : vector<8x16xf32>
    %36 = vector.extract_strided_slice %25 {offsets = [0, 48], sizes = [8, 16], strides = [1, 1]} : vector<8x96xf32> to vector<8x16xf32>
    %cst_38 = arith.constant dense<0.000000e+00> : vector<8x16xf32>
    %37 = tpu.matmul %13, %36, %cst_38 {dimension_numbers = #tpu.dot_dimension_numbers<[1], [0], [0], [1], [0, 0, 1, 1], [], []>} : vector<8x8xf32>, vector<8x16xf32>, vector<8x16xf32> -> vector<8x16xf32>
    %38 = vector.extract_strided_slice %25 {offsets = [0, 64], sizes = [8, 16], strides = [1, 1]} : vector<8x96xf32> to vector<8x16xf32>
    %cst_39 = arith.constant dense<0.000000e+00> : vector<8x16xf32>
    %39 = tpu.matmul %15, %38, %cst_39 {dimension_numbers = #tpu.dot_dimension_numbers<[1], [0], [0], [1], [0, 0, 1, 1], [], []>} : vector<8x8xf32>, vector<8x16xf32>, vector<8x16xf32> -> vector<8x16xf32>
    %40 = arith.addf %37, %39 : vector<8x16xf32>
    %41 = vector.extract_strided_slice %25 {offsets = [0, 80], sizes = [8, 16], strides = [1, 1]} : vector<8x96xf32> to vector<8x16xf32>
    %cst_40 = arith.constant dense<0.000000e+00> : vector<8x16xf32>
    %42 = tpu.matmul %17, %41, %cst_40 {dimension_numbers = #tpu.dot_dimension_numbers<[1], [0], [0], [1], [0, 0, 1, 1], [], []>} : vector<8x8xf32>, vector<8x16xf32>, vector<8x16xf32> -> vector<8x16xf32>
    %43 = arith.addf %40, %42 : vector<8x16xf32>
    %44 = vector.broadcast %22 : vector<8x1xf32> to vector<8x16xf32>
    %45 = arith.addf %44, %43 : vector<8x16xf32>
    %cst_41 = arith.constant dense<0.000000e+00> : vector<8x256xf32>
    %46 = tpu.matmul %35, %4, %cst_41 {dimension_numbers = #tpu.dot_dimension_numbers<[1], [0], [0], [1], [0, 0, 1, 1], [], []>} : vector<8x16xf32>, vector<16x256xf32>, vector<8x256xf32> -> vector<8x256xf32>
    %cst_42 = arith.constant dense<0.000000e+00> : vector<8x256xf32>
    %47 = tpu.matmul %45, %5, %cst_42 {dimension_numbers = #tpu.dot_dimension_numbers<[1], [0], [0], [1], [0, 0, 1, 1], [], []>} : vector<8x16xf32>, vector<16x256xf32>, vector<8x256xf32> -> vector<8x256xf32>
    %48 = arith.mulf %46, %47 : vector<8x256xf32>
    %cst_43 = arith.constant 0.000000e+00 : f32
    %49 = vector.broadcast %cst_43 : f32 to vector<8x256xf32>
    %50 = arith.maximumf %48, %49 : vector<8x256xf32>
    %cst_44 = arith.constant dense<0.000000e+00> : vector<8x256xf32>
    %51 = tpu.matmul %18, %50, %cst_44 {dimension_numbers = #tpu.dot_dimension_numbers<[1], [0], [0], [1], [0, 0, 1, 1], [], []>} : vector<8x8xf32>, vector<8x256xf32>, vector<8x256xf32> -> vector<8x256xf32>
    %52 = vector.broadcast %24 : vector<8x1xf32> to vector<8x256xf32>
    %53 = arith.addf %51, %52 : vector<8x256xf32>
    %c0_45 = arith.constant 0 : index
    %c0_46 = arith.constant 0 : index
    %54 = vector.load %arg1[%c0_45, %c0_46] : memref<8x256xf32, #tpu.memory_space<vmem>>, vector<8x256xf32>
    %55 = arith.negf %53 : vector<8x256xf32>
    %56 = math.exp %55 : vector<8x256xf32>
    %cst_47 = arith.constant 1.000000e+00 : f32
    %57 = vector.broadcast %cst_47 : f32 to vector<8x256xf32>
    %58 = arith.addf %57, %56 : vector<8x256xf32>
    %59 = arith.divf %57, %58 : vector<8x256xf32>
    %60 = arith.mulf %59, %54 : vector<8x256xf32>
    %c0_48 = arith.constant 0 : index
    %c0_49 = arith.constant 0 : index
    %61 = vector.load %arg8[%c0_48, %c0_49] : memref<8x256xf32, #tpu.memory_space<vmem>>, vector<8x256xf32>
    tpu.vector_store %arg8[%c0_48, %c0_49], %60 {strides = array<i32>} : memref<8x256xf32, #tpu.memory_space<vmem>>, vector<8x256xf32>,
    return
  }
  func.func @transform_0(%arg0: i32) -> (i32, i32) {
    %c0_i32 = arith.constant 0 : i32
    %c0_i32_0 = arith.constant 0 : i32
    return %arg0, %c0_i32 : i32, i32
  }
  func.func @transform_1(%arg0: i32) -> (i32, i32) {
    %c0_i32 = arith.constant 0 : i32
    %c0_i32_0 = arith.constant 0 : i32
    %c0_i32_1 = arith.constant 0 : i32
    return %c0_i32, %c0_i32_0 : i32, i32
  }
  func.func @transform_2(%arg0: i32) -> (i32, i32) {
    %c0_i32 = arith.constant 0 : i32
    %c0_i32_0 = arith.constant 0 : i32
    %c0_i32_1 = arith.constant 0 : i32
    return %c0_i32, %c0_i32_0 : i32, i32
  }
  func.func @transform_3(%arg0: i32) -> (i32, i32) {
    %c0_i32 = arith.constant 0 : i32
    %c0_i32_0 = arith.constant 0 : i32
    %c0_i32_1 = arith.constant 0 : i32
    return %c0_i32, %c0_i32_0 : i32, i32
  }
  func.func @transform_4(%arg0: i32) -> (i32, i32, i32) {
    %c0_i32 = arith.constant 0 : i32
    %c0_i32_0 = arith.constant 0 : i32
    %c0_i32_1 = arith.constant 0 : i32
    %c0_i32_2 = arith.constant 0 : i32
    return %c0_i32, %c0_i32_0, %c0_i32_1 : i32, i32, i32
  }
  func.func @transform_5(%arg0: i32) -> (i32, i32) {
    %c0_i32 = arith.constant 0 : i32
    %c0_i32_0 = arith.constant 0 : i32
    %c0_i32_1 = arith.constant 0 : i32
    return %c0_i32, %c0_i32_0 : i32, i32
  }
  func.func @transform_6(%arg0: i32) -> (i32, i32, i32) {
    %c0_i32 = arith.constant 0 : i32
    %c0_i32_0 = arith.constant 0 : i32
    %c0_i32_1 = arith.constant 0 : i32
    %c0_i32_2 = arith.constant 0 : i32
    return %c0_i32, %c0_i32_0, %c0_i32_1 : i32, i32, i32
  }
  func.func @transform_7(%arg0: i32) -> (i32, i32) {
    %c0_i32 = arith.constant 0 : i32
    %c0_i32_0 = arith.constant 0 : i32
    return %arg0, %c0_i32 : i32, i32
  }
}

</mosaic_0001>

<bundles_post_ra>
// kernel: tpu_custom_call.1
= control target key start
LH: loop header
LB: loop body
LE: loop exit
PB: predicated region body
PF: predicated region fallthrough
CT: control target
= control target key end

     0   :  { %s1325_s0 = inlined_call_operand.vmem [shape: f32[8,256], index: 0, kind: input, shape index: {}]   ;;  %s1326_s1 = inlined_call_operand.vmem [shape: f32[256,96], index: 1, kind: input, shape index: {}]   ;;  %s1327_s2 = inlined_call_operand.vmem [shape: f32[16,256], index: 2, kind: input, shape index: {}]   ;;  %s1328_s3 = inlined_call_operand.vmem [shape: f32[16,256], index: 3, kind: input, shape index: {}]   ;;  %s1329_s4 = inlined_call_operand.vmem [shape: f32[6,8,8], index: 4, kind: input, shape index: {}]   ;;  %s1330_s5 = inlined_call_operand.vmem [shape: f32[8,8], index: 5, kind: input, shape index: {}]   ;;  %s1331_s6 = inlined_call_operand.vmem [shape: f32[3,8,1], index: 6, kind: input, shape index: {}]   ;;  %s1332_s7 = inlined_call_operand.hbm [shape: f32[8,256], index: 7, kind: output, shape index: {}]  }
   0x1   :  { %v45_v0 = vld [vmem:[%s1326_s1 + $0x80] sm:$0xff]  ;;  %v46_v1 = vld [vmem:[%s1326_s1 + $0x88] sm:$0xff]  ;;  %v47_v5 = vld [vmem:[%s1326_s1 + $0x90] sm:$0xff] }
   0x2   :  { %v29_v2 = vld [vmem:[%s1326_s1] sm:$0xff]  ;;  %v987_v3 = vpack.c.bf16 %v46_v1, %v45_v0  ;;  %v30_v4 = vld [vmem:[%s1326_s1 + $0x8] sm:$0xff]  ;;  %v48_v6 = vld [vmem:[%s1326_s1 + $0x98] sm:$0xff] }
   0x3   :  { %v989_v7 = vpack.c.bf16 %v30_v4, %v29_v2  ;;  %v991_v8 = vpack.c.bf16 %v48_v6, %v47_v5  ;;  %v31_v9 = vld [vmem:[%s1326_s1 + $0x10] sm:$0xff]  ;;  %v32_v10 = vld [vmem:[%s1326_s1 + $0x18] sm:$0xff]  ;;  %v49_v11 = vld [vmem:[%s1326_s1 + $0xa0] sm:$0xff] }
   0x4   :  { %988 = vmatprep.subr.bf16.mxu0 %v987_v3  ;;  %v50_v12 = vld [vmem:[%s1326_s1 + $0xa8] sm:$0xff]  ;;  %v993_v13 = vpack.c.bf16 %v32_v10, %v31_v9  ;;  %v33_v15 = vld [vmem:[%s1326_s1 + $0x20] sm:$0xff]  ;;  %v51_v17 = vld [vmem:[%s1326_s1 + $0xb0] sm:$0xff] }
   0x5   :  { %990 = vmatpush3.bf16.msra.mxu0 %v989_v7  ;;  %v995_v14 = vpack.c.bf16 %v50_v12, %v49_v11  ;;  %v34_v16 = vld [vmem:[%s1326_s1 + $0x28] sm:$0xff]  ;;  %v52_v18 = vld [vmem:[%s1326_s1 + $0xb8] sm:$0xff]  ;;  %v35_v21 = vld [vmem:[%s1326_s1 + $0x30] sm:$0xff] }
   0x6   :  { %992 = vmatprep.subr.bf16.mxu0 %v991_v8  ;;  %v997_v19 = vpack.c.bf16 %v34_v16, %v33_v15  ;;  %v999_v20 = vpack.c.bf16 %v52_v18, %v51_v17  ;;  %v36_v22 = vld [vmem:[%s1326_s1 + $0x38] sm:$0xff]  ;;  %v53_v23 = vld [vmem:[%s1326_s1 + $0xc0] sm:$0xff]  ;;  %v54_v24 = vld [vmem:[%s1326_s1 + $0xc8] sm:$0xff] }
   0x7   :  { %v1176_v25 = vld [vmem:[%s1325_s0 + $0x8] sm:$0xff] }
   0x8   :  { %125 = vmatprep.mubr.f32.mxu0 %v1176_v25 }
   0x9   :  { %994 = vmatpush3.bf16.msra.mxu0 %v993_v13 }
   0xa   :  { %996 = vmatprep.subr.bf16.mxu0 %v995_v14 }
   0xb   :  { %12 = vsyncpa [#allocation4], 0  ;;  %v1001_v26 = vpack.c.bf16 %v36_v22, %v35_v21  ;;  %v1003_v27 = vpack.c.bf16 %v54_v24, %v53_v23  ;;  %v37_v28 = vld [vmem:[%s1326_s1 + $0x40] sm:$0xff]  ;;  %v38_v29 = vld [vmem:[%s1326_s1 + $0x48] sm:$0xff]  ;;  %v1070_v50 = vmov 0.0   ;;  %vm1071_vm0 = vmmov 0  }
   0xc   :  { %v55_v30 = vld [vmem:[%s1326_s1 + $0xd0] sm:$0xff]  ;;  %v56_v31 = vld [vmem:[%s1326_s1 + $0xd8] sm:$0xff]  ;;  %v1005_v32 = vpack.c.bf16 %v38_v29, %v37_v28  ;;  %v57_v36 = vld [vmem:[%s1326_s1 + $0xe0] sm:$0xff]  ;;  %957 = vmatprep.subr.mxu1 %v1070_v50  ;;  %959 = vmatprep.mubr.msk.f32.mxu1 %vm1071_vm0, %v1070_v50  ;;  %vm131_vm1 = vcmask 785408   ;;  %s1073_s23 = smov 112   ;;  %s1075_s24 = smov 96  }
   0xd   :  { %998 = vmatpush3.bf16.msra.mxu0 %v997_v19  ;;  %v1007_v33 = vpack.c.bf16 %v56_v31, %v55_v30  ;;  %v39_v34 = vld [vmem:[%s1326_s1 + $0x50] sm:$0xff]  ;;  %v40_v35 = vld [vmem:[%s1326_s1 + $0x58] sm:$0xff]  ;;  %v58_v37 = vld [vmem:[%s1326_s1 + $0xe8] sm:$0xff]  ;;  %s1076_s25 = smov 48   ;;  %v1077_v56 = vmov 0   ;;  %vm163_vm2 = vcmask 64512  }
   0xe   :  { %1000 = vmatprep.subr.bf16.mxu0 %v999_v20  ;;  %v1009_v38 = vpack.c.bf16 %v40_v35, %v39_v34  ;;  %v1011_v39 = vpack.c.bf16 %v58_v37, %v57_v36  ;;  %v41_v40 = vld [vmem:[%s1326_s1 + $0x60] sm:$0xff]  ;;  %v42_v41 = vld [vmem:[%s1326_s1 + $0x68] sm:$0xff]  ;;  %v59_v42 = vld [vmem:[%s1326_s1 + $0xf0] sm:$0xff]  ;;  %1036 = vset.pattern.permute.xlu1 %v1077_v56  ;;  %vm628_vm3 = vcmask 130048  }
   0xf   :  { %v60_v43 = vld [vmem:[%s1326_s1 + $0xf8] sm:$0xff]  ;;  %v1013_v44 = vpack.c.bf16 %v42_v41, %v41_v40  ;;  %v43_v46 = vld [vmem:[%s1326_s1 + $0x70] sm:$0xff]  ;;  %v1224_v49 = vld [vmem:[%s1325_s0] sm:$0xff]  ;;  %s1074_s0 = smov 80   ;;  %1037 = vset.pattern.permute.xlu0 %v1077_v56 }
  0x10   :  { %v1015_v45 = vpack.c.bf16 %v60_v43, %v59_v42  ;;  %v44_v47 = vld [vmem:[%s1326_s1 + $0x78] sm:$0xff]  ;;  %s1072_s1 = smov 64   ;;  %v153_v55 = vld [vmem:[%s1331_s6] sm:$0xff]  ;;  %v897_v57 = vld [vmem:[%s1331_s6 + $0x8] sm:$0xff] }
  0x11   :  { %1002 = vmatpush3.bf16.msra.mxu0 %v1001_v26  ;;  %v1017_v48 = vpack.c.bf16 %v44_v47, %v43_v46  ;;  %v898_v58 = vld [vmem:[%s1331_s6 + $0x10] sm:$0xff]  ;;  %v892_v59 = vld [vmem:[%s1329_s4 + $0x8] sm:$0xff]  ;;  %v141_v61 = vld [vmem:[%s1329_s4] sm:$0xff] }
  0x12   :  { %1004 = vmatprep.subr.bf16.mxu0 %v1003_v27  ;;  %v893_v63 = vld [vmem:[%s1329_s4 + $0x10] sm:$0xff]  ;;  %v895_v1 = vld [vmem:[%s1329_s4 + $0x20] sm:$0xff]  ;;  %v894_v3 = vld [vmem:[%s1329_s4 + $0x18] sm:$0xff] }
  0x13   :  { %v896_v5 = vld [vmem:[%s1329_s4 + $0x28] sm:$0xff]  ;;  %v136_v7 = vld [vmem:[%s1327_s2 + $0x18] sm:$0xff]  ;;  %v133_v9 = vld [vmem:[%s1327_s2] sm:$0xff] }
  0x14   :  { %v134_v6 = vld [vmem:[%s1327_s2 + $0x8] sm:$0xff]  ;;  %v135_v10 = vld [vmem:[%s1327_s2 + $0x10] sm:$0xff]  ;;  %v140_v13 = vld [vmem:[%s1328_s3 + $0x18] sm:$0xff] }
  0x15   :  { %1006 = vmatpush3.bf16.msra.mxu0 %v1005_v32  ;;  %v1019_v8 = vpack.c.bf16 %v136_v7, %v134_v6  ;;  %v1021_v11 = vpack.c.bf16 %v135_v10, %v133_v9  ;;  %v138_v12 = vld [vmem:[%s1328_s3 + $0x8] sm:$0xff]  ;;  %v137_v20 = vld [vmem:[%s1328_s3] sm:$0xff]  ;;  %v139_v21 = vld [vmem:[%s1328_s3 + $0x10] sm:$0xff] }
  0x16   :  { %1008 = vmatprep.subr.bf16.mxu0 %v1007_v33  ;;  %v1023_v14 = vpack.c.bf16 %v140_v13, %v138_v12  ;;  %v1025_v27 = vpack.c.bf16 %v139_v21, %v137_v20  ;;  %v152_v47 = vld [vmem:[%s1330_s5] sm:$0xff]  ;;  %s1078_s5 = smov [#allocation3]  }
  0x17   :  { %s884_s10 = sshll.u32 %s1078_s5, 4  ;;  %s885_s10 = int_to_ptr.vmem [resolvable:$true] %s884_s10 }
  0x18   :  { %s1046_s11 = scalar_lea.vmem %s885_s10, 256  ;;  %p1051_p1 = scmp.lt.s32.totalorder %s885_s10, %s885_s10 }
  0x19   :  { %1010 = vmatpush3.bf16.msra.mxu0 %v1009_v38  ;;  %p1047_p0 = scmp.ne.s32.totalorder %s885_s10, %s1046_s11  ;;  %p1052_p2 = scmp.lt.s32.totalorder %s1046_s11, %s1046_s11 }
  0x1a   :  { %1012 = vmatprep.subr.bf16.mxu0 %v1011_v39 }
  0x1b   :  { %p1053_p3 = por %p1052_p2, %p1051_p1 }
  0x1d   :  { %1014 = vmatpush3.bf16.msra.mxu0 %v1013_v44  ;;  %p1054_p4 = pnand %p1053_p3, %p1047_p0 }
  0x1e   :  { %1016 = vmatprep.subr.bf16.mxu0 %v1015_v45 }
  0x21   :  { %1018 = vmatpush3.bf16.msra.mxu0 %v1017_v48 }
  0x24   :  { %126 = vmatmul.mubr.f32.vlgmr.msra.gmra.mrb[0].mxu0 %v1224_v49 }
  0xf7   :  { %v942_v51 = vpop.f32.mrb[0].mxu0 }
  0xf8   :  { %v943_v52 = vpop.f32.mrb[1].mxu0 }
  0xf9   :  { %v944_v53 = vadd.f32 %v943_v52, %v942_v51 }
  0xfb   :  { %132 = vst.msk [vmem:[#allocation2] sm:$0xff] %vm131_vm1, %v944_v53 }
 0x102   :  { %v158_v54 = vld [vmem:[#allocation2] sm:$0xff] }
 0x103   :  { %393 = vrot.lane.b32.xlu1 %v158_v54, %s1072_s1  ;;  %160 = vrot.lane.b32.xlu0 %v158_v54, %s1073_s23 }
 0x107   :  { %469 = vrot.lane.b32.xlu1 %v158_v54, %s1074_s0  ;;  %310 = vrot.lane.b32.xlu0 %v158_v54, %s1075_s24 }
 0x10b   :  { %545 = vrot.lane.b32.xlu0 %v158_v54, %s1076_s25  ;;  %389 = vperm.xlu1 %1036, %v153_v55  }
 0x10f   :  { %624 = vperm.xlu0 %1037, %v897_v57   ;;  %783 = vperm.xlu1 %1036, %v898_v58  }
 0x175   :  { %v161_v60 = vpop.permute.xlu0 %160  ;;  %v394_v0 = vpop.permute.xlu1 %393 }
 0x176   :  { %958 = vmatpush3.msra.mxu1 %v161_v60 }
 0x177   :  { %960 = vmatmul.mubr.msk.f32.vlgmr.msra.gmra.mrb[0].mxu1 %vm163_vm2, %v892_v59  ;;  %962 = vmatprep.subr.mxu1 %v1070_v50 }
 0x178   :  { %963 = vmatpush3.msra.mxu1 %v158_v54  ;;  %964 = vmatprep.mubr.msk.f32.mxu1 %vm1071_vm0, %v1070_v50 }
 0x179   :  { %v311_v62 = vpop.permute.xlu0 %310  ;;  %967 = vmatprep.subr.mxu1 %v1070_v50  ;;  %v470_v2 = vpop.permute.xlu1 %469 }
 0x17b   :  { %965 = vmatmul.mubr.msk.f32.vlgmr.msra.gmra.mrb[2].mxu1 %vm163_vm2, %v141_v61 }
 0x17c   :  { %968 = vmatpush3.msra.mxu1 %v311_v62  ;;  %969 = vmatprep.mubr.msk.f32.mxu1 %vm1071_vm0, %v1070_v50 }
 0x17d   :  { %972 = vmatprep.subr.mxu1 %v1070_v50  ;;  %v546_v4 = vpop.permute.xlu0 %545 }
 0x17f   :  { %970 = vmatmul.mubr.msk.f32.vlgmr.msra.gmra.mrb[4].mxu1 %vm163_vm2, %v893_v63 }
 0x180   :  { %973 = vmatpush3.msra.mxu1 %v394_v0  ;;  %974 = vmatprep.mubr.msk.f32.mxu1 %vm1071_vm0, %v1070_v50 }
 0x181   :  { %977 = vmatprep.subr.mxu1 %v1070_v50 }
 0x183   :  { %975 = vmatmul.mubr.msk.f32.vlgmr.msra.gmra.mrb[6].mxu1 %vm163_vm2, %v895_v1 }
 0x184   :  { %978 = vmatpush3.msra.mxu1 %v470_v2  ;;  %979 = vmatprep.mubr.msk.f32.mxu1 %vm1071_vm0, %v1070_v50 }
 0x185   :  { %982 = vmatprep.subr.mxu1 %v1070_v50 }
 0x187   :  { %980 = vmatmul.mubr.msk.f32.vlgmr.msra.gmra.mrb[8].mxu1 %vm163_vm2, %v894_v3 }
 0x188   :  { %983 = vmatpush3.msra.mxu1 %v546_v4  ;;  %984 = vmatprep.mubr.msk.f32.mxu1 %vm1071_vm0, %v1070_v50 }
 0x189   :  { %1020 = vmatprep.subr.bf16.mxu1 %v1019_v8 }
 0x18a   :  { %v390_v23 = vpop.permute.xlu1 %389 }
 0x18b   :  { %985 = vmatmul.mubr.msk.f32.vlgmr.msra.gmra.mrb[10].mxu1 %vm163_vm2, %v896_v5 }
 0x18c   :  { %696 = vmatprep.mubr.f32.mxu1 %v1070_v50  ;;  %1022 = vmatpush1.bf16.msra.mxu1 %v1021_v11 }
 0x18d   :  { %1024 = vmatprep.subr.bf16.mxu1 %v1023_v14 }
 0x18e   :  { %v625_v35 = vpop.permute.xlu0 %624  ;;  %v784_v48 = vpop.permute.xlu1 %783 }
 0x24a   :  { %v233_v15 = vpop.f32.mrb[0].mxu1 }
 0x24b   :  { %v961_v16 = vpop.f32.mrb[1].mxu1 }
 0x24e   :  { %v306_v17 = vpop.f32.mrb[2].mxu1 }
 0x24f   :  { %v307_v18 = vadd.f32 %v306_v17, %v233_v15  ;;  %v966_v19 = vpop.f32.mrb[3].mxu1 }
 0x252   :  { %v382_v22 = vpop.f32.mrb[4].mxu1 }
 0x253   :  { %v386_v24 = vadd.f32 %v382_v22, %v307_v18  ;;  %v971_v26 = vpop.f32.mrb[5].mxu1 }
 0x255   :  { %v392_v28 = vadd.f32 %v390_v23, %v386_v24 }
 0x256   :  { %v465_v29 = vpop.f32.mrb[6].mxu1 }
 0x257   :  { %v976_v30 = vpop.f32.mrb[7].mxu1  ;;  %905 = vmatmul.mubr.msk.f32.vlgmr.msra.gmra.mrb[12].mxu1 %vm628_vm3, %v392_v28 }
 0x258   :  { %1026 = vmatpush1.bf16.msra.mxu1 %v1025_v27  ;;  %770 = vmatprep.mubr.f32.mxu1 %v1070_v50 }
 0x25a   :  { %v541_v31 = vpop.f32.mrb[8].mxu1 }
 0x25b   :  { %v542_v32 = vadd.f32 %v541_v31, %v465_v29  ;;  %v981_v33 = vpop.f32.mrb[9].mxu1 }
 0x25e   :  { %v617_v34 = vpop.f32.mrb[10].mxu1 }
 0x25f   :  { %v621_v36 = vadd.f32 %v617_v34, %v542_v32  ;;  %v986_v37 = vpop.f32.mrb[11].mxu1 }
 0x261   :  { %v627_v38 = vadd.f32 %v625_v35, %v621_v36 }
 0x263   :  { %906 = vmatmul.mubr.msk.f32.vlgmr.msra.gmra.mrb[14].mxu1 %vm628_vm3, %v627_v38 }
 0x264   :  { %853 = vmatprep.mubr.f32.mxu1 %v1070_v50 }
 0x32a   :  { %v698_v39 = vpop.f32.mrb[12].mxu1 }
 0x32b   :  { %v700_v40 = vpop.f32.mrb[13].mxu1 }
 0x336   :  { %v772_v41 = vpop.f32.mrb[14].mxu1 }
 0x337   :  { %v777_v42 = vmul.f32 %v772_v41, %v698_v39  ;;  %v774_v43 = vpop.f32.mrb[15].mxu1 }
 0x338   :  { %v778_v44 = vmul.f32 %v774_v43, %v700_v40 }
 0x339   :  { %v779_v46 = vmax.f32 %v777_v42, 0.0 }
 0x33a   :  { %v780_v45 = vmax.f32 %v778_v44, 0.0 }
 0x33c   :  { %789 = vmatprep.subr.mxu1 %v780_v45 }
 0x33d   :  { %790 = vmatpush1.msra.mxu1 %v779_v46 }
 0x33e   :  { %907 = vmatmul.mubr.msk.f32.vlgmr.msra.gmra.mrb[16].mxu1 %vm163_vm2, %v152_v47 }
 0x411   :  { %v855_v51 = vpop.f32.mrb[16].mxu1 }
 0x412   :  { %v856_v52 = vadd.f32 %v855_v51, %v784_v48  ;;  %v857_v50 = vpop.f32.mrb[17].mxu1 }
 0x413   :  { %v858_v53 = vadd.f32 %v857_v50, %v784_v48 }
 0x414   :  { %v908_v54 = vmul.f32 -1.442695, %v856_v52 }
 0x415   :  { %v909_v55 = vmul.f32 -1.442695, %v858_v53 }
 0x416   :  { %1038 = vpow2.f32 %v908_v54 }
 0x417   :  { %1040 = vpow2.f32 %v909_v55 }
 0x420   :  { %v1039_v56 = vpop.eup %1038 }
 0x421   :  { %v1041_v57 = vpop.eup %1040  ;;  %v868_v58 = vadd.f32 1.0, %v1039_v56 }
 0x422   :  { %v869_v59 = vadd.f32 1.0, %v1041_v57 }
 0x423   :  { %1042 = vrcp.f32 %v868_v58 }
 0x424   :  { %1044 = vrcp.f32 %v869_v59 }
 0x42d   :  { %v1043_v60 = vpop.eup %1042 }
 0x42e   :  { %v1045_v61 = vpop.eup %1044  ;;  %v874_v62 = vmul.f32 %v1043_v60, %v1224_v49 }
 0x42f   :  { %v875_v63 = vmul.f32 %v1045_v61, %v1176_v25 }
 0x430   :  { %876 = vst [vmem:[#allocation3] sm:$0xff] %v874_v62 }
 0x431   :  { %877 = vst [vmem:[#allocation3 + $0x8] sm:$0xff] %v875_v63 }
 0x432   :  { %1057 = shalt.err (!%p1054_p4)
}
 0x433   :  { %s1058_s13 = scalar_lea.hbm %s1332_s7, 256 }
 0x434   :  { %p1059_p5 = scmp.ne.s32.totalorder %s1332_s7, %s1058_s13  ;;  %p1062_p6 = scmp.lt.u32.totalorder %s1058_s13, %s1332_s7 }
 0x436   :  { %p1064_p7 = pnand %p1062_p6, %p1059_p5 }
 0x438   :  { %1067 = shalt.err (!%p1064_p7)
}
 0x439   :  { %887 = dma.vmem_to_hbm [thread:$0]  %s885_s10, 256, %s1332_s7, [#allocation4]  }
 0x43a   :  { %1068 = dma.done.wait [#allocation4], 256  }
 0x43b   :  { %1069 = vsyncadd [#allocation4], 4294967040 }
 0x43c   :  { %891 = vsyncpa [#allocation4], 1 }

</bundles_post_ra>
